<compile_context>
chip_gen: v7x
topology: tpu7x:2x2x1
jax: 0.10.0
libtpu: 0.0.40
codegen_flags: <defaults>
</compile_context>

<pallas_src>
import jax
import jax.numpy as jnp
import numpy as np
from jax.experimental import pallas as pl
from jax.experimental.pallas import tpu as pltpu


def rnn_fc_kernel(x_ref,      # (T, Bp, Dp) f32, time-major, ones column at D
                  w_ref,      # (Dp + 2*H2 + Bp, H2) f32 packed weights
                  out_ref):   # (Bp, Op=H2) f32
    T, Bp, Dp = x_ref.shape
    H2 = w_ref.shape[1]
    H = H2 // 2

    # --- Packed weights: static, tile-aligned slices; cast once to bf16 for
    #     the MXU fast path (accumulation stays f32).
    w_all = w_ref[...]
    w_in = w_all[0:Dp, :].astype(jnp.bfloat16)                    # (Dp, H2)
    w_blk = w_all[Dp:Dp + H2, :].astype(jnp.bfloat16)             # (H2, H2)
    fc_w = w_all[Dp + H2:Dp + 2 * H2, :].astype(jnp.bfloat16)     # (H2, H2)
    fc_b = w_all[Dp + 2 * H2:Dp + 2 * H2 + Bp, :]                 # (Bp, H2) f32

    # (1) Hoisted layer-0 projection + both biases (ones-column fold), kept
    #     entirely in vregs:  add[t] = [x_t @ W_ih0^T + b0 | b1].
    x_flat = x_ref[...].reshape(T * Bp, Dp).astype(jnp.bfloat16)
    add = jnp.dot(x_flat, w_in, preferred_element_type=jnp.float32)  # (T*Bp, H2) f32

    # (2) Pipelined 2-layer recurrence.  State s_t = [h0_t | h1_{t-1}].
    #     Init: h0_0 = tanh(add[0] first half), h1_{-1} = 0.
    lane = jax.lax.broadcasted_iota(jnp.int32, (Bp, H2), 1)
    first_half = lane < H
    s = jnp.where(first_half, jnp.tanh(add[0:Bp, :]), 0.0)

    # One fused (Bp,2H)@(2H,2H) bf16 MXU matmul + one f32 tanh per step.
    # Fully unrolled: T is small and static, so the scheduler sees the chain.
    for t in range(1, T):
        s = jnp.tanh(
            jnp.dot(s.astype(jnp.bfloat16), w_blk,
                    preferred_element_type=jnp.float32)
            + add[t * Bp:(t + 1) * Bp, :])

    # Epilogue step finishes h1_{T-1}.  Only the second (layer-1, b1) half of
    # the addend matters; the garbage first half of s is killed by the zero
    # rows of fc_w.
    s = jnp.tanh(
        jnp.dot(s.astype(jnp.bfloat16), w_blk,
                preferred_element_type=jnp.float32)
        + add[(T - 1) * Bp:T * Bp, :])

    # (3) fc(hn[-1]) + bias: lane-dense (Bp,2H)@(2H,Op) matmul, unmasked store.
    out_ref[...] = (
        jnp.dot(s.astype(jnp.bfloat16), fc_w,
                preferred_element_type=jnp.float32)
        + fc_b)


def pack_params(params, batch_size):
    """One-time packing of all weights into a single lane-dense f32 slab."""
    H = params["w_hh_l0"].shape[0]
    D = params["w_ih_l0"].shape[1]
    O = params["fc_w"].shape[0]
    H2 = 2 * H
    Bp = max(16, ((batch_size + 15) // 16) * 16)       # bf16 sublane tile
    Dp = ((D + 1 + 127) // 128) * 128                  # +1 ones column (bias fold)
    Op = ((O + 127) // 128) * 128
    # Current formulation assumes 2*hidden_dim is exactly lane-dense and the
    # padded fc output rides in the same column width (true for hidden_dim=64).
    assert H2 % 128 == 0, "kernel assumes 2*hidden_dim is a multiple of 128"
    assert Op == H2, "packed layout assumes padded fc width == 2*hidden_dim"

    f32 = jnp.float32
    # W_in (Dp, H2): [W_ih0^T | 0] plus a bias row at index D: [b0 | b1].
    w_in = jnp.zeros((Dp, H2), f32)
    w_in = w_in.at[:D, :H].set(jnp.asarray(params["w_ih_l0"], f32).T)
    w_in = w_in.at[D, :H].set(jnp.asarray(params["b_ih_l0"] + params["b_hh_l0"], f32))
    w_in = w_in.at[D, H:].set(jnp.asarray(params["b_ih_l1"] + params["b_hh_l1"], f32))

    # W_blk (H2, H2): [h0|h1] @ W_blk = [h0@W_hh0^T | h0@W_ih1^T + h1@W_hh1^T]
    w_blk = jnp.zeros((H2, H2), f32)
    w_blk = w_blk.at[:H, :H].set(jnp.asarray(params["w_hh_l0"], f32).T)
    w_blk = w_blk.at[:H, H:].set(jnp.asarray(params["w_ih_l1"], f32).T)
    w_blk = w_blk.at[H:, H:].set(jnp.asarray(params["w_hh_l1"], f32).T)

    # fc weight embedded in the 2H state (zero rows kill the h0 half).
    fc_w = jnp.zeros((H2, Op), f32).at[H:, :O].set(jnp.asarray(params["fc_w"], f32).T)
    # fc bias replicated across Bp rows so the kernel adds it with no broadcast.
    fc_b = jnp.zeros((Bp, Op), f32).at[:, :O].set(jnp.asarray(params["fc_b"], f32)[None, :])

    packed = jnp.concatenate([w_in, w_blk, fc_w, fc_b], axis=0)   # (Dp+2*H2+Bp, H2)
    meta = dict(Bp=Bp, Dp=Dp, D=D, O=O, Op=Op)
    return packed, meta


def build_forward(params, batch_size):
    """Packs weights once and returns a jitted forward(x) -> (B, O)."""
    packed, meta = pack_params(params, batch_size)
    Bp, Dp, D, O, Op = meta["Bp"], meta["Dp"], meta["D"], meta["O"], meta["Op"]
    vmem = pl.BlockSpec(memory_space=pltpu.MemorySpace.VMEM)

    @jax.jit
    def forward(x):
        B, T, _ = x.shape
        # Time-major, zero-padded, with a ones column at index D (bias fold).
        x_tm = jnp.transpose(x, (1, 0, 2)).astype(jnp.float32)          # (T,B,D)
        x_aug = jnp.zeros((T, Bp, Dp), jnp.float32)
        x_aug = x_aug.at[:, :B, :D].set(x_tm)
        x_aug = x_aug.at[:, :, D].set(1.0)

        out_pad = pl.pallas_call(
            rnn_fc_kernel,
            out_shape=jax.ShapeDtypeStruct((Bp, Op), jnp.float32),
            in_specs=[vmem, vmem],
            out_specs=vmem,
        )(x_aug, packed)
        return out_pad[:B, :O]

    return forward


def reference_forward(x, params):
    """Pure-JAX f32 reference with identical semantics (for validation)."""
    B, T, _ = x.shape
    H = params["w_hh_l0"].shape[0]
    h0 = jnp.zeros((B, H), jnp.float32)
    h1 = jnp.zeros((B, H), jnp.float32)
    for t in range(T):
        xt = x[:, t, :]
        h0 = jnp.tanh(xt @ params["w_ih_l0"].T + params["b_ih_l0"]
                      + h0 @ params["w_hh_l0"].T + params["b_hh_l0"])
        h1 = jnp.tanh(h0 @ params["w_ih_l1"].T + params["b_ih_l1"]
                      + h1 @ params["w_hh_l1"].T + params["b_hh_l1"])
    return h1 @ params["fc_w"].T + params["fc_b"]


def init_params(key, input_dim, hidden_dim, output_dim):
    """Deterministic init mimicking PyTorch's U(-1/sqrt(H), 1/sqrt(H))."""
    k = 1.0 / np.sqrt(hidden_dim)
    keys = jax.random.split(key, 10)
    u = lambda kk, shape: jax.random.uniform(kk, shape, jnp.float32, -k, k)
    return {
        "w_ih_l0": u(keys[0], (hidden_dim, input_dim)),
        "w_hh_l0": u(keys[1], (hidden_dim, hidden_dim)),
        "b_ih_l0": u(keys[2], (hidden_dim,)),
        "b_hh_l0": u(keys[3], (hidden_dim,)),
        "w_ih_l1": u(keys[4], (hidden_dim, hidden_dim)),
        "w_hh_l1": u(keys[5], (hidden_dim, hidden_dim)),
        "b_ih_l1": u(keys[6], (hidden_dim,)),
        "b_hh_l1": u(keys[7], (hidden_dim,)),
        "fc_w":    u(keys[8], (output_dim, hidden_dim)),
        "fc_b":    u(keys[9], (output_dim,)),
    }


if __name__ == "__main__":
    # Shapes consistent with the module: batch=2, seq=8, input_dim=4,
    # hidden_dim=64, num_layers=2, output_dim=1.
    B, T, D, H, O = 2, 8, 4, 64, 1
    key = jax.random.PRNGKey(0)
    pkey, xkey = jax.random.split(key)
    params = init_params(pkey, D, H, O)
    x = jax.random.normal(xkey, (B, T, D), jnp.float32)

    forward = build_forward(params, batch_size=B)
    out = jax.block_until_ready(forward(x))
    ref = reference_forward(x, params)
    assert out.shape == (B, O)
    # bf16 MXU passes with f32 accumulation: tolerance relaxed vs f32 reference.
    np.testing.assert_allclose(np.asarray(out), np.asarray(ref),
                               rtol=2e-2, atol=2e-2)
    print("KERNEL_OK")
</pallas_src>

<mosaic_0001>
module attributes {stable_mosaic.version = 11 : i64} {
  func.func @rnn_fc_kernel(%arg0: memref<8x16x128xf32, #tpu.memory_space<vmem>>, %arg1: memref<400x128xf32, #tpu.memory_space<vmem>>, %arg2: memref<16x128xf32, #tpu.memory_space<vmem>>) attributes {dimension_semantics = [], scalar_prefetch = 0 : i64, scratch_operands = 0 : i64, tpu.core_type = #tpu.core_type<tc>} {
    %c0 = arith.constant 0 : index
    %c0_0 = arith.constant 0 : index
    %0 = vector.load %arg1[%c0, %c0_0] : memref<400x128xf32, #tpu.memory_space<vmem>>, vector<400x128xf32>
    %1 = vector.extract_strided_slice %0 {offsets = [0, 0], sizes = [128, 128], strides = [1, 1]} : vector<400x128xf32> to vector<128x128xf32>
    %2 = arith.truncf %1 : vector<128x128xf32> to vector<128x128xbf16>
    %3 = vector.extract_strided_slice %0 {offsets = [128, 0], sizes = [128, 128], strides = [1, 1]} : vector<400x128xf32> to vector<128x128xf32>
    %4 = arith.truncf %3 : vector<128x128xf32> to vector<128x128xbf16>
    %5 = vector.extract_strided_slice %0 {offsets = [256, 0], sizes = [128, 128], strides = [1, 1]} : vector<400x128xf32> to vector<128x128xf32>
    %6 = arith.truncf %5 : vector<128x128xf32> to vector<128x128xbf16>
    %7 = vector.extract_strided_slice %0 {offsets = [384, 0], sizes = [16, 128], strides = [1, 1]} : vector<400x128xf32> to vector<16x128xf32>
    %c0_1 = arith.constant 0 : index
    %c0_2 = arith.constant 0 : index
    %c0_3 = arith.constant 0 : index
    %8 = vector.load %arg0[%c0_1, %c0_2, %c0_3] : memref<8x16x128xf32, #tpu.memory_space<vmem>>, vector<8x16x128xf32>
    %9 = vector.shape_cast %8 : vector<8x16x128xf32> to vector<128x128xf32>
    %10 = arith.truncf %9 : vector<128x128xf32> to vector<128x128xbf16>
    %cst = arith.constant dense<0.000000e+00> : vector<128x128xf32>
    %11 = tpu.matmul %10, %2, %cst {dimension_numbers = #tpu.dot_dimension_numbers<[1], [0], [0], [1], [0, 0, 1, 1], [], []>} : vector<128x128xbf16>, vector<128x128xbf16>, vector<128x128xf32> -> vector<128x128xf32>
    %12 = tpu.iota {dimensions = array<i32: 1>} : vector<16x128xi32>
    %c64_i32 = arith.constant 64 : i32
    %13 = vector.broadcast %c64_i32 : i32 to vector<16x128xi32>
    %14 = arith.cmpi slt, %12, %13 : vector<16x128xi32>
    %15 = vector.extract_strided_slice %11 {offsets = [0, 0], sizes = [16, 128], strides = [1, 1]} : vector<128x128xf32> to vector<16x128xf32>
    %16 = math.tanh %15 : vector<16x128xf32>
    %cst_4 = arith.constant 0.000000e+00 : f32
    %17 = vector.broadcast %cst_4 : f32 to vector<16x128xf32>
    %18 = arith.select %14, %16, %17 : vector<16x128xi1>, vector<16x128xf32>
    %19 = arith.truncf %18 : vector<16x128xf32> to vector<16x128xbf16>
    %cst_5 = arith.constant dense<0.000000e+00> : vector<16x128xf32>
    %20 = tpu.matmul %19, %4, %cst_5 {dimension_numbers = #tpu.dot_dimension_numbers<[1], [0], [0], [1], [0, 0, 1, 1], [], []>} : vector<16x128xbf16>, vector<128x128xbf16>, vector<16x128xf32> -> vector<16x128xf32>
    %21 = vector.extract_strided_slice %11 {offsets = [16, 0], sizes = [16, 128], strides = [1, 1]} : vector<128x128xf32> to vector<16x128xf32>
    %22 = arith.addf %20, %21 : vector<16x128xf32>
    %23 = math.tanh %22 : vector<16x128xf32>
    %24 = arith.truncf %23 : vector<16x128xf32> to vector<16x128xbf16>
    %cst_6 = arith.constant dense<0.000000e+00> : vector<16x128xf32>
    %25 = tpu.matmul %24, %4, %cst_6 {dimension_numbers = #tpu.dot_dimension_numbers<[1], [0], [0], [1], [0, 0, 1, 1], [], []>} : vector<16x128xbf16>, vector<128x128xbf16>, vector<16x128xf32> -> vector<16x128xf32>
    %26 = vector.extract_strided_slice %11 {offsets = [32, 0], sizes = [16, 128], strides = [1, 1]} : vector<128x128xf32> to vector<16x128xf32>
    %27 = arith.addf %25, %26 : vector<16x128xf32>
    %28 = math.tanh %27 : vector<16x128xf32>
    %29 = arith.truncf %28 : vector<16x128xf32> to vector<16x128xbf16>
    %cst_7 = arith.constant dense<0.000000e+00> : vector<16x128xf32>
    %30 = tpu.matmul %29, %4, %cst_7 {dimension_numbers = #tpu.dot_dimension_numbers<[1], [0], [0], [1], [0, 0, 1, 1], [], []>} : vector<16x128xbf16>, vector<128x128xbf16>, vector<16x128xf32> -> vector<16x128xf32>
    %31 = vector.extract_strided_slice %11 {offsets = [48, 0], sizes = [16, 128], strides = [1, 1]} : vector<128x128xf32> to vector<16x128xf32>
    %32 = arith.addf %30, %31 : vector<16x128xf32>
    %33 = math.tanh %32 : vector<16x128xf32>
    %34 = arith.truncf %33 : vector<16x128xf32> to vector<16x128xbf16>
    %cst_8 = arith.constant dense<0.000000e+00> : vector<16x128xf32>
    %35 = tpu.matmul %34, %4, %cst_8 {dimension_numbers = #tpu.dot_dimension_numbers<[1], [0], [0], [1], [0, 0, 1, 1], [], []>} : vector<16x128xbf16>, vector<128x128xbf16>, vector<16x128xf32> -> vector<16x128xf32>
    %36 = vector.extract_strided_slice %11 {offsets = [64, 0], sizes = [16, 128], strides = [1, 1]} : vector<128x128xf32> to vector<16x128xf32>
    %37 = arith.addf %35, %36 : vector<16x128xf32>
    %38 = math.tanh %37 : vector<16x128xf32>
    %39 = arith.truncf %38 : vector<16x128xf32> to vector<16x128xbf16>
    %cst_9 = arith.constant dense<0.000000e+00> : vector<16x128xf32>
    %40 = tpu.matmul %39, %4, %cst_9 {dimension_numbers = #tpu.dot_dimension_numbers<[1], [0], [0], [1], [0, 0, 1, 1], [], []>} : vector<16x128xbf16>, vector<128x128xbf16>, vector<16x128xf32> -> vector<16x128xf32>
    %41 = vector.extract_strided_slice %11 {offsets = [80, 0], sizes = [16, 128], strides = [1, 1]} : vector<128x128xf32> to vector<16x128xf32>
    %42 = arith.addf %40, %41 : vector<16x128xf32>
    %43 = math.tanh %42 : vector<16x128xf32>
    %44 = arith.truncf %43 : vector<16x128xf32> to vector<16x128xbf16>
    %cst_10 = arith.constant dense<0.000000e+00> : vector<16x128xf32>
    %45 = tpu.matmul %44, %4, %cst_10 {dimension_numbers = #tpu.dot_dimension_numbers<[1], [0], [0], [1], [0, 0, 1, 1], [], []>} : vector<16x128xbf16>, vector<128x128xbf16>, vector<16x128xf32> -> vector<16x128xf32>
    %46 = vector.extract_strided_slice %11 {offsets = [96, 0], sizes = [16, 128], strides = [1, 1]} : vector<128x128xf32> to vector<16x128xf32>
    %47 = arith.addf %45, %46 : vector<16x128xf32>
    %48 = math.tanh %47 : vector<16x128xf32>
    %49 = arith.truncf %48 : vector<16x128xf32> to vector<16x128xbf16>
    %cst_11 = arith.constant dense<0.000000e+00> : vector<16x128xf32>
    %50 = tpu.matmul %49, %4, %cst_11 {dimension_numbers = #tpu.dot_dimension_numbers<[1], [0], [0], [1], [0, 0, 1, 1], [], []>} : vector<16x128xbf16>, vector<128x128xbf16>, vector<16x128xf32> -> vector<16x128xf32>
    %51 = vector.extract_strided_slice %11 {offsets = [112, 0], sizes = [16, 128], strides = [1, 1]} : vector<128x128xf32> to vector<16x128xf32>
    %52 = arith.addf %50, %51 : vector<16x128xf32>
    %53 = math.tanh %52 : vector<16x128xf32>
    %54 = arith.truncf %53 : vector<16x128xf32> to vector<16x128xbf16>
    %cst_12 = arith.constant dense<0.000000e+00> : vector<16x128xf32>
    %55 = tpu.matmul %54, %4, %cst_12 {dimension_numbers = #tpu.dot_dimension_numbers<[1], [0], [0], [1], [0, 0, 1, 1], [], []>} : vector<16x128xbf16>, vector<128x128xbf16>, vector<16x128xf32> -> vector<16x128xf32>
    %56 = vector.extract_strided_slice %11 {offsets = [112, 0], sizes = [16, 128], strides = [1, 1]} : vector<128x128xf32> to vector<16x128xf32>
    %57 = arith.addf %55, %56 : vector<16x128xf32>
    %58 = math.tanh %57 : vector<16x128xf32>
    %59 = arith.truncf %58 : vector<16x128xf32> to vector<16x128xbf16>
    %cst_13 = arith.constant dense<0.000000e+00> : vector<16x128xf32>
    %60 = tpu.matmul %59, %6, %cst_13 {dimension_numbers = #tpu.dot_dimension_numbers<[1], [0], [0], [1], [0, 0, 1, 1], [], []>} : vector<16x128xbf16>, vector<128x128xbf16>, vector<16x128xf32> -> vector<16x128xf32>
    %61 = arith.addf %60, %7 : vector<16x128xf32>
    %c0_14 = arith.constant 0 : index
    %c0_15 = arith.constant 0 : index
    %62 = vector.load %arg2[%c0_14, %c0_15] : memref<16x128xf32, #tpu.memory_space<vmem>>, vector<16x128xf32>
    tpu.vector_store %arg2[%c0_14, %c0_15], %61 {strides = array<i32>} : memref<16x128xf32, #tpu.memory_space<vmem>>, vector<16x128xf32>,
    return
  }
}

</mosaic_0001>

<bundles_post_ra>
// kernel: forward.1
= control target key start
LH: loop header
LB: loop body
LE: loop exit
PB: predicated region body
PF: predicated region fallthrough
CT: control target
= control target key end

     0   :  { %v964_v3 = vmov 0.0   ;;  %vm965_vm0 = vmmov 0   ;;  %s1387_s1 = inlined_call_operand.vmem [shape: f32[400,128], index: 1, kind: input, shape index: {}]   ;;  %s1388_s0 = inlined_call_operand.vmem [shape: f32[8,16,128], index: 0, kind: input, shape index: {}]   ;;  %s1389_s2 = inlined_call_operand.vmem [shape: f32[16,128], index: 2, kind: output, shape index: {}]  }
   0x1   :  { %v12_v0 = vld [vmem:[%s1387_s1] sm:$0xff]  ;;  %v13_v1 = vld [vmem:[%s1387_s1 + $0x8] sm:$0xff]  ;;  %v14_v2 = vld [vmem:[%s1387_s1 + $0x10] sm:$0xff]  ;;  %746 = vmatprep.subr.bf16.mxu1 %v964_v3  ;;  %762 = vmatprep.mubr.msk.bf16.mxu1 %vm965_vm0, %v964_v3 }
   0x2   :  { %v62_v4 = vpack.c.bf16 %v13_v1, %v12_v0  ;;  %v15_v5 = vld [vmem:[%s1387_s1 + $0x18] sm:$0xff]  ;;  %v16_v7 = vld [vmem:[%s1387_s1 + $0x20] sm:$0xff]  ;;  %v17_v8 = vld [vmem:[%s1387_s1 + $0x28] sm:$0xff] }
   0x3   :  { %v63_v6 = vpack.c.bf16 %v15_v5, %v14_v2  ;;  %v64_v9 = vpack.c.bf16 %v17_v8, %v16_v7  ;;  %v86_v10 = vld [vmem:[%s1388_s0] sm:$0xff]  ;;  %v87_v11 = vld [vmem:[%s1388_s0 + $0x8] sm:$0xff]  ;;  %v18_v12 = vld [vmem:[%s1387_s1 + $0x30] sm:$0xff]  ;;  %v207_v8 = vlaneseq }
   0x4   :  { %714 = vmatprep.subr.bf16.mxu0 %v62_v4  ;;  %v19_v13 = vld [vmem:[%s1387_s1 + $0x38] sm:$0xff]  ;;  %v102_v14 = vpack.c.bf16 %v87_v11, %v86_v10  ;;  %v28_v15 = vld [vmem:[%s1387_s1 + $0x80] sm:$0xff]  ;;  %v29_v16 = vld [vmem:[%s1387_s1 + $0x88] sm:$0xff] }
   0x5   :  { %715 = vmatpush3.bf16.msra.mxu0 %v62_v4  ;;  %v30_v17 = vld [vmem:[%s1387_s1 + $0x90] sm:$0xff]  ;;  %v31_v18 = vld [vmem:[%s1387_s1 + $0x98] sm:$0xff]  ;;  %v1024_v19 = vpack.c.bf16 %v29_v16, %v28_v15  ;;  %v65_v20 = vpack.c.bf16 %v19_v13, %v18_v12  ;;  %v20_v21 = vld [vmem:[%s1387_s1 + $0x40] sm:$0xff] }
   0x6   :  { %716 = vmatprep.subr.bf16.mxu0 %v63_v6  ;;  %730 = vmatprep.mubr.bf16.mxu0 %v102_v14  ;;  %v21_v22 = vld [vmem:[%s1387_s1 + $0x48] sm:$0xff]  ;;  %v1033_v23 = vpack.c.bf16 %v31_v18, %v30_v17  ;;  %v32_v24 = vld [vmem:[%s1387_s1 + $0xa0] sm:$0xff]  ;;  %v22_v27 = vld [vmem:[%s1387_s1 + $0x50] sm:$0xff] }
   0x7   :  { %747 = vmatpush3.bf16.msra.mxu1 %v1024_v19  ;;  %v33_v25 = vld [vmem:[%s1387_s1 + $0xa8] sm:$0xff]  ;;  %v66_v26 = vpack.c.bf16 %v21_v22, %v20_v21  ;;  %v23_v28 = vld [vmem:[%s1387_s1 + $0x58] sm:$0xff]  ;;  %v34_v30 = vld [vmem:[%s1387_s1 + $0xb0] sm:$0xff] }
   0x8   :  { %748 = vmatprep.subr.bf16.mxu1 %v964_v3  ;;  %v1049_v29 = vpack.c.bf16 %v33_v25, %v32_v24  ;;  %v35_v31 = vld [vmem:[%s1387_s1 + $0xb8] sm:$0xff]  ;;  %v67_v32 = vpack.c.bf16 %v23_v28, %v22_v27  ;;  %v24_v33 = vld [vmem:[%s1387_s1 + $0x60] sm:$0xff]  ;;  %v25_v34 = vld [vmem:[%s1387_s1 + $0x68] sm:$0xff] }
   0x9   :  { %717 = vmatpush3.bf16.msra.mxu0 %v63_v6  ;;  %v1065_v35 = vpack.c.bf16 %v35_v31, %v34_v30  ;;  %v68_v36 = vpack.c.bf16 %v25_v34, %v24_v33  ;;  %v26_v37 = vld [vmem:[%s1387_s1 + $0x70] sm:$0xff]  ;;  %v27_v38 = vld [vmem:[%s1387_s1 + $0x78] sm:$0xff]  ;;  %v36_v43 = vld [vmem:[%s1387_s1 + $0xc0] sm:$0xff] }
   0xa   :  { %718 = vmatprep.subr.bf16.mxu0 %v64_v9  ;;  %v69_v39 = vpack.c.bf16 %v27_v38, %v26_v37  ;;  %v88_v40 = vld [vmem:[%s1388_s0 + $0x10] sm:$0xff]  ;;  %v89_v41 = vld [vmem:[%s1388_s0 + $0x18] sm:$0xff]  ;;  %v37_v44 = vld [vmem:[%s1387_s1 + $0xc8] sm:$0xff] }
   0xb   :  { %749 = vmatpush3.bf16.msra.mxu1 %v1033_v23  ;;  %v103_v42 = vpack.c.bf16 %v89_v41, %v88_v40  ;;  %v1097_v45 = vpack.c.bf16 %v37_v44, %v36_v43  ;;  %v38_v46 = vld [vmem:[%s1387_s1 + $0xd0] sm:$0xff]  ;;  %v39_v47 = vld [vmem:[%s1387_s1 + $0xd8] sm:$0xff]  ;;  %v40_v49 = vld [vmem:[%s1387_s1 + $0xe0] sm:$0xff] }
   0xc   :  { %750 = vmatprep.subr.bf16.mxu1 %v964_v3  ;;  %v1109_v48 = vpack.c.bf16 %v39_v47, %v38_v46  ;;  %v41_v50 = vld [vmem:[%s1387_s1 + $0xe8] sm:$0xff]  ;;  %v42_v52 = vld [vmem:[%s1387_s1 + $0xf0] sm:$0xff]  ;;  %v43_v53 = vld [vmem:[%s1387_s1 + $0xf8] sm:$0xff] }
   0xd   :  { %719 = vmatpush3.bf16.msra.mxu0 %v64_v9  ;;  %v1120_v51 = vpack.c.bf16 %v41_v50, %v40_v49  ;;  %v1132_v54 = vpack.c.bf16 %v43_v53, %v42_v52  ;;  %v90_v55 = vld [vmem:[%s1388_s0 + $0x20] sm:$0xff]  ;;  %v91_v56 = vld [vmem:[%s1388_s0 + $0x28] sm:$0xff]  ;;  %v92_v57 = vld [vmem:[%s1388_s0 + $0x30] sm:$0xff]  ;;  %v208_v9 = vand.u32 127, %v207_v8 }
   0xe   :  { %720 = vmatprep.subr.bf16.mxu0 %v65_v20  ;;  %v104_v58 = vpack.c.bf16 %v91_v56, %v90_v55  ;;  %v93_v59 = vld [vmem:[%s1388_s0 + $0x38] sm:$0xff]  ;;  %v94_v60 = vld [vmem:[%s1388_s0 + $0x40] sm:$0xff]  ;;  %v95_v61 = vld [vmem:[%s1388_s0 + $0x48] sm:$0xff] }
   0xf   :  { %751 = vmatpush3.bf16.msra.mxu1 %v1049_v29  ;;  %v105_v62 = vpack.c.bf16 %v93_v59, %v92_v57  ;;  %v106_v63 = vpack.c.bf16 %v95_v61, %v94_v60  ;;  %v96_v0 = vld [vmem:[%s1388_s0 + $0x50] sm:$0xff]  ;;  %v97_v1 = vld [vmem:[%s1388_s0 + $0x58] sm:$0xff]  ;;  %vm209_vm1 = vcmp.lt.s32.totalorder %v208_v9, 64  ;;  %v98_v13 = vld [vmem:[%s1388_s0 + $0x60] sm:$0xff] }
  0x10   :  { %752 = vmatprep.subr.bf16.mxu1 %v964_v3  ;;  %v107_v2 = vpack.c.bf16 %v97_v1, %v96_v0  ;;  %vm614_vm2 = vmpackc.low %vm209_vm1, %vm209_vm1  ;;  %v99_v14 = vld [vmem:[%s1388_s0 + $0x68] sm:$0xff]  ;;  %v100_v16 = vld [vmem:[%s1388_s0 + $0x70] sm:$0xff] }
  0x11   :  { %721 = vmatpush3.bf16.msra.mxu0 %v65_v20  ;;  %v108_v15 = vpack.c.bf16 %v99_v14, %v98_v13  ;;  %v101_v17 = vld [vmem:[%s1388_s0 + $0x78] sm:$0xff] }
  0x12   :  { %722 = vmatprep.subr.bf16.mxu0 %v66_v26  ;;  %v109_v18 = vpack.c.bf16 %v101_v17, %v100_v16 }
  0x13   :  { %753 = vmatpush3.bf16.msra.mxu1 %v1065_v35 }
  0x14   :  { %754 = vmatprep.subr.bf16.mxu1 %v964_v3 }
  0x15   :  { %723 = vmatpush3.bf16.msra.mxu0 %v66_v26 }
  0x16   :  { %724 = vmatprep.subr.bf16.mxu0 %v67_v32 }
  0x17   :  { %755 = vmatpush3.bf16.msra.mxu1 %v1097_v45 }
  0x18   :  { %756 = vmatprep.subr.bf16.mxu1 %v964_v3 }
  0x19   :  { %725 = vmatpush3.bf16.msra.mxu0 %v67_v32 }
  0x1a   :  { %726 = vmatprep.subr.bf16.mxu0 %v68_v36 }
  0x1b   :  { %757 = vmatpush3.bf16.msra.mxu1 %v1109_v48 }
  0x1c   :  { %758 = vmatprep.subr.bf16.mxu1 %v964_v3 }
  0x1d   :  { %727 = vmatpush3.bf16.msra.mxu0 %v68_v36 }
  0x1e   :  { %728 = vmatprep.subr.bf16.mxu0 %v69_v39 }
  0x1f   :  { %759 = vmatpush3.bf16.msra.mxu1 %v1120_v51 }
  0x20   :  { %760 = vmatprep.subr.bf16.mxu1 %v964_v3 }
  0x21   :  { %729 = vmatpush3.bf16.msra.mxu0 %v69_v39 }
  0x22   :  { %766 = vmatprep.subr.bf16.mxu0 %v964_v3 }
  0x23   :  { %761 = vmatpush3.bf16.msra.mxu1 %v1132_v54 }
  0x24   :  { %731 = vmatmul.mubr.bf16.vlgmr.msra.gmra.mrb[0].mxu0 %v103_v42  ;;  %786 = vmatprep.subr.bf16.mxu1 %v964_v3 }
  0x25   :  { %767 = vmatpush3.bf16.msra.mxu0 %v1024_v19  ;;  %734 = vmatprep.mubr.bf16.mxu0 %v104_v58 }
  0x26   :  { %768 = vmatprep.subr.bf16.mxu0 %v964_v3 }
  0x29   :  { %769 = vmatpush3.bf16.msra.mxu0 %v1033_v23 }
  0x2a   :  { %770 = vmatprep.subr.bf16.mxu0 %v964_v3 }
  0x2c   :  { %735 = vmatmul.mubr.bf16.gmra.mrb[4].mxu0 %v105_v62 }
  0x2d   :  { %771 = vmatpush3.bf16.msra.mxu0 %v1049_v29  ;;  %738 = vmatprep.mubr.bf16.mxu0 %v106_v63 }
  0x2e   :  { %772 = vmatprep.subr.bf16.mxu0 %v964_v3 }
  0x31   :  { %773 = vmatpush3.bf16.msra.mxu0 %v1065_v35 }
  0x32   :  { %774 = vmatprep.subr.bf16.mxu0 %v964_v3 }
  0x34   :  { %739 = vmatmul.mubr.bf16.gmra.mrb[8].mxu0 %v107_v2 }
  0x35   :  { %775 = vmatpush3.bf16.msra.mxu0 %v1097_v45  ;;  %742 = vmatprep.mubr.bf16.mxu0 %v108_v15 }
  0x36   :  { %776 = vmatprep.subr.bf16.mxu0 %v964_v3 }
  0x39   :  { %777 = vmatpush3.bf16.msra.mxu0 %v1109_v48 }
  0x3a   :  { %778 = vmatprep.subr.bf16.mxu0 %v964_v3 }
  0x3c   :  { %743 = vmatmul.mubr.bf16.gmra.mrb[12].mxu0 %v109_v18 }
  0x3d   :  { %779 = vmatpush3.bf16.msra.mxu0 %v1120_v51  ;;  %782 = vmatprep.mubr.msk.bf16.mxu0 %vm965_vm0, %v964_v3 }
  0x3e   :  { %780 = vmatprep.subr.bf16.mxu0 %v964_v3 }
  0x41   :  { %781 = vmatpush3.bf16.msra.mxu0 %v1132_v54 }
  0x42   :  { %806 = vmatprep.subr.bf16.mxu0 %v964_v3 }
  0xf7   :  { %v732_v4 = vpop.f32.mrb[0].mxu0 }
  0xf8   :  { %v144_v5 = vpop.f32.mrb[1].mxu0 }
  0xf9   :  { %v733_v6 = vpop.f32.mrb[2].mxu0  ;;  %928 = vtanh.f32 %v144_v5 }
  0xfa   :  { %v147_v7 = vpop.f32.mrb[3].mxu0 }
  0xfb   :  { %930 = vtanh.f32 %v147_v7 }
  0xff   :  { %v1197_v20 = vpop.f32.mrb[4].mxu0 }
 0x100   :  { %v160_v21 = vpop.f32.mrb[5].mxu0 }
 0x101   :  { %v1199_v22 = vpop.f32.mrb[6].mxu0 }
 0x102   :  { %v163_v24 = vpop.f32.mrb[7].mxu0 }
 0x103   :  { %v929_v10 = vpop.eup %928 }
 0x105   :  { %v931_v11 = vpop.eup %930 }
 0x106   :  { %v615_v12 = vpack.c.bf16 %v931_v11, %v929_v10 }
 0x107   :  { %v1201_v25 = vpop.f32.mrb[8].mxu0 }
 0x108   :  { %763 = vmatmul.mubr.msk.bf16.vlgmr.msra.gmra.mrb[0].mxu1 %vm614_vm2, %v615_v12  ;;  %v1203_v26 = vpop.f32.mrb[9].mxu0 }
 0x109   :  { %787 = vmatpush3.bf16.msra.mxu1 %v1024_v19  ;;  %802 = vmatprep.mubr.msk.bf16.mxu1 %vm965_vm0, %v964_v3  ;;  %v1205_v27 = vpop.f32.mrb[10].mxu0 }
 0x10a   :  { %788 = vmatprep.subr.bf16.mxu1 %v964_v3  ;;  %v1207_v28 = vpop.f32.mrb[11].mxu0 }
 0x10d   :  { %789 = vmatpush3.bf16.msra.mxu1 %v1033_v23 }
 0x10e   :  { %790 = vmatprep.subr.bf16.mxu1 %v964_v3 }
 0x10f   :  { %v1227_v40 = vpop.f32.mrb[12].mxu0 }
 0x110   :  { %v1229_v41 = vpop.f32.mrb[13].mxu0 }
 0x111   :  { %791 = vmatpush3.bf16.msra.mxu1 %v1049_v29  ;;  %v1231_v42 = vpop.f32.mrb[14].mxu0 }
 0x112   :  { %792 = vmatprep.subr.bf16.mxu1 %v964_v3  ;;  %v1233_v43 = vpop.f32.mrb[15].mxu0 }
 0x115   :  { %793 = vmatpush3.bf16.msra.mxu1 %v1065_v35 }
 0x116   :  { %794 = vmatprep.subr.bf16.mxu1 %v964_v3 }
 0x119   :  { %795 = vmatpush3.bf16.msra.mxu1 %v1097_v45 }
 0x11a   :  { %796 = vmatprep.subr.bf16.mxu1 %v964_v3 }
 0x11d   :  { %797 = vmatpush3.bf16.msra.mxu1 %v1109_v48 }
 0x11e   :  { %798 = vmatprep.subr.bf16.mxu1 %v964_v3 }
 0x121   :  { %799 = vmatpush3.bf16.msra.mxu1 %v1120_v51 }
 0x122   :  { %800 = vmatprep.subr.bf16.mxu1 %v964_v3 }
 0x125   :  { %801 = vmatpush3.bf16.msra.mxu1 %v1132_v54 }
 0x126   :  { %826 = vmatprep.subr.bf16.mxu1 %v964_v3 }
 0x1db   :  { %v249_v30 = vpop.f32.mrb[0].mxu1 }
 0x1dc   :  { %v250_v31 = vadd.f32 %v732_v4, %v249_v30  ;;  %v764_v32 = vpop.f32.mrb[1].mxu1 }
 0x1dd   :  { %v252_v33 = vpop.f32.mrb[2].mxu1  ;;  %v49_v32 = vld [vmem:[%s1387_s1 + $0x128] sm:$0xff] }
 0x1de   :  { %v253_v34 = vadd.f32 %v733_v6, %v252_v33  ;;  %v765_v36 = vpop.f32.mrb[3].mxu1  ;;  %932 = vtanh.f32 %v250_v31  ;;  %v48_v31 = vld [vmem:[%s1387_s1 + $0x120] sm:$0xff] }
 0x1df   :  { %v80_v33 = vpack.c.bf16 %v49_v32, %v48_v31  ;;  %v51_v36 = vld [vmem:[%s1387_s1 + $0x138] sm:$0xff] }
 0x1e0   :  { %934 = vtanh.f32 %v253_v34  ;;  %v50_v34 = vld [vmem:[%s1387_s1 + $0x130] sm:$0xff] }
 0x1e8   :  { %v933_v37 = vpop.eup %932 }
 0x1ea   :  { %v935_v38 = vpop.eup %934 }
 0x1eb   :  { %v258_v39 = vpack.c.bf16 %v935_v38, %v933_v37  ;;  %v81_v37 = vpack.c.bf16 %v51_v36, %v50_v34 }
 0x1ed   :  { %783 = vmatmul.mubr.bf16.vlgmr.msra.gmra.mrb[16].mxu0 %v258_v39 }
 0x1ee   :  { %807 = vmatpush3.bf16.msra.mxu0 %v1024_v19  ;;  %822 = vmatprep.mubr.msk.bf16.mxu0 %vm965_vm0, %v964_v3 }
 0x1ef   :  { %808 = vmatprep.subr.bf16.mxu0 %v964_v3 }
 0x1f2   :  { %809 = vmatpush3.bf16.msra.mxu0 %v1033_v23 }
 0x1f3   :  { %810 = vmatprep.subr.bf16.mxu0 %v964_v3 }
 0x1f6   :  { %811 = vmatpush3.bf16.msra.mxu0 %v1049_v29 }
 0x1f7   :  { %812 = vmatprep.subr.bf16.mxu0 %v964_v3 }
 0x1fa   :  { %813 = vmatpush3.bf16.msra.mxu0 %v1065_v35 }
 0x1fb   :  { %814 = vmatprep.subr.bf16.mxu0 %v964_v3 }
 0x1fe   :  { %815 = vmatpush3.bf16.msra.mxu0 %v1097_v45 }
 0x1ff   :  { %816 = vmatprep.subr.bf16.mxu0 %v964_v3 }
 0x202   :  { %817 = vmatpush3.bf16.msra.mxu0 %v1109_v48 }
 0x203   :  { %818 = vmatprep.subr.bf16.mxu0 %v964_v3 }
 0x206   :  { %819 = vmatpush3.bf16.msra.mxu0 %v1120_v51 }
 0x207   :  { %820 = vmatprep.subr.bf16.mxu0 %v964_v3 }
 0x20a   :  { %821 = vmatpush3.bf16.msra.mxu0 %v1132_v54 }
 0x20b   :  { %846 = vmatprep.subr.bf16.mxu0 %v964_v3 }
 0x2c0   :  { %v293_v44 = vpop.f32.mrb[16].mxu0 }
 0x2c1   :  { %v294_v46 = vadd.f32 %v293_v44, %v160_v21  ;;  %v784_v47 = vpop.f32.mrb[17].mxu0 }
 0x2c2   :  { %v296_v49 = vpop.f32.mrb[18].mxu0 }
 0x2c3   :  { %v297_v50 = vadd.f32 %v296_v49, %v163_v24  ;;  %v785_v52 = vpop.f32.mrb[19].mxu0  ;;  %936 = vtanh.f32 %v294_v46 }
 0x2c4   :  { %v52_v52 = vld [vmem:[%s1387_s1 + $0x140] sm:$0xff] }
 0x2c5   :  { %938 = vtanh.f32 %v297_v50 }
 0x2cd   :  { %v937_v53 = vpop.eup %936 }
 0x2cf   :  { %v939_v55 = vpop.eup %938 }
 0x2d0   :  { %v302_v56 = vpack.c.bf16 %v939_v55, %v937_v53  ;;  %v53_v53 = vld [vmem:[%s1387_s1 + $0x148] sm:$0xff] }
 0x2d1   :  { %v82_v55 = vpack.c.bf16 %v53_v53, %v52_v52 }
 0x2d2   :  { %803 = vmatmul.mubr.bf16.vlgmr.msra.gmra.mrb[4].mxu1 %v302_v56  ;;  %v54_v56 = vld [vmem:[%s1387_s1 + $0x150] sm:$0xff] }
 0x2d3   :  { %827 = vmatpush3.bf16.msra.mxu1 %v1024_v19  ;;  %842 = vmatprep.mubr.msk.bf16.mxu1 %vm965_vm0, %v964_v3 }
 0x2d4   :  { %828 = vmatprep.subr.bf16.mxu1 %v964_v3 }
 0x2d7   :  { %829 = vmatpush3.bf16.msra.mxu1 %v1033_v23 }
 0x2d8   :  { %830 = vmatprep.subr.bf16.mxu1 %v964_v3 }
 0x2db   :  { %831 = vmatpush3.bf16.msra.mxu1 %v1049_v29 }
 0x2dc   :  { %832 = vmatprep.subr.bf16.mxu1 %v964_v3 }
 0x2df   :  { %833 = vmatpush3.bf16.msra.mxu1 %v1065_v35 }
 0x2e0   :  { %834 = vmatprep.subr.bf16.mxu1 %v964_v3 }
 0x2e3   :  { %835 = vmatpush3.bf16.msra.mxu1 %v1097_v45 }
 0x2e4   :  { %836 = vmatprep.subr.bf16.mxu1 %v964_v3 }
 0x2e7   :  { %837 = vmatpush3.bf16.msra.mxu1 %v1109_v48 }
 0x2e8   :  { %838 = vmatprep.subr.bf16.mxu1 %v964_v3 }
 0x2eb   :  { %839 = vmatpush3.bf16.msra.mxu1 %v1120_v51 }
 0x2ec   :  { %840 = vmatprep.subr.bf16.mxu1 %v964_v3 }
 0x2ef   :  { %841 = vmatpush3.bf16.msra.mxu1 %v1132_v54 }
 0x2f0   :  { %866 = vmatprep.subr.bf16.mxu1 %v964_v3 }
 0x3a5   :  { %v337_v57 = vpop.f32.mrb[4].mxu1 }
 0x3a6   :  { %v338_v58 = vadd.f32 %v1197_v20, %v337_v57  ;;  %v804_v59 = vpop.f32.mrb[5].mxu1  ;;  %v55_v57 = vld [vmem:[%s1387_s1 + $0x158] sm:$0xff] }
 0x3a7   :  { %v340_v60 = vpop.f32.mrb[6].mxu1  ;;  %v56_v59 = vld [vmem:[%s1387_s1 + $0x160] sm:$0xff] }
 0x3a8   :  { %v341_v61 = vadd.f32 %v1199_v22, %v340_v60  ;;  %v805_v62 = vpop.f32.mrb[7].mxu1  ;;  %940 = vtanh.f32 %v338_v58  ;;  %v83_v58 = vpack.c.bf16 %v55_v57, %v54_v56  ;;  %v57_v60 = vld [vmem:[%s1387_s1 + $0x168] sm:$0xff] }
 0x3a9   :  { %v58_v62 = vld [vmem:[%s1387_s1 + $0x170] sm:$0xff] }
 0x3aa   :  { %942 = vtanh.f32 %v341_v61  ;;  %v84_v61 = vpack.c.bf16 %v57_v60, %v56_v59 }
 0x3b2   :  { %v941_v63 = vpop.eup %940 }
 0x3b4   :  { %v943_v0 = vpop.eup %942 }
 0x3b5   :  { %v346_v1 = vpack.c.bf16 %v943_v0, %v941_v63  ;;  %v59_v63 = vld [vmem:[%s1387_s1 + $0x178] sm:$0xff] }
 0x3b6   :  { %v85_v0 = vpack.c.bf16 %v59_v63, %v58_v62 }
 0x3b7   :  { %823 = vmatmul.mubr.bf16.vlgmr.msra.gmra.mrb[20].mxu0 %v346_v1 }
 0x3b8   :  { %847 = vmatpush3.bf16.msra.mxu0 %v1024_v19  ;;  %862 = vmatprep.mubr.msk.bf16.mxu0 %vm965_vm0, %v964_v3 }
 0x3b9   :  { %848 = vmatprep.subr.bf16.mxu0 %v964_v3 }
 0x3bc   :  { %849 = vmatpush3.bf16.msra.mxu0 %v1033_v23 }
 0x3bd   :  { %850 = vmatprep.subr.bf16.mxu0 %v964_v3 }
 0x3c0   :  { %851 = vmatpush3.bf16.msra.mxu0 %v1049_v29 }
 0x3c1   :  { %852 = vmatprep.subr.bf16.mxu0 %v964_v3 }
 0x3c4   :  { %853 = vmatpush3.bf16.msra.mxu0 %v1065_v35 }
 0x3c5   :  { %854 = vmatprep.subr.bf16.mxu0 %v964_v3 }
 0x3c8   :  { %855 = vmatpush3.bf16.msra.mxu0 %v1097_v45 }
 0x3c9   :  { %856 = vmatprep.subr.bf16.mxu0 %v964_v3 }
 0x3cc   :  { %857 = vmatpush3.bf16.msra.mxu0 %v1109_v48 }
 0x3cd   :  { %858 = vmatprep.subr.bf16.mxu0 %v964_v3 }
 0x3d0   :  { %859 = vmatpush3.bf16.msra.mxu0 %v1120_v51 }
 0x3d1   :  { %860 = vmatprep.subr.bf16.mxu0 %v964_v3 }
 0x3d4   :  { %861 = vmatpush3.bf16.msra.mxu0 %v1132_v54 }
 0x3d5   :  { %886 = vmatprep.subr.bf16.mxu0 %v964_v3 }
 0x48a   :  { %v381_v2 = vpop.f32.mrb[20].mxu0 }
 0x48b   :  { %v382_v4 = vadd.f32 %v381_v2, %v1203_v26  ;;  %v824_v5 = vpop.f32.mrb[21].mxu0  ;;  %v46_v26 = vld [vmem:[%s1387_s1 + $0x110] sm:$0xff] }
 0x48c   :  { %v384_v6 = vpop.f32.mrb[22].mxu0 }
 0x48d   :  { %v385_v7 = vadd.f32 %v384_v6, %v1207_v28  ;;  %v825_v8 = vpop.f32.mrb[23].mxu0  ;;  %944 = vtanh.f32 %v382_v4  ;;  %v47_v28 = vld [vmem:[%s1387_s1 + $0x118] sm:$0xff] }
 0x48e   :  { %v79_v30 = vpack.c.bf16 %v47_v28, %v46_v26 }
 0x48f   :  { %946 = vtanh.f32 %v385_v7 }
 0x497   :  { %v945_v9 = vpop.eup %944 }
 0x499   :  { %v947_v10 = vpop.eup %946 }
 0x49a   :  { %v390_v11 = vpack.c.bf16 %v947_v10, %v945_v9 }
 0x49c   :  { %843 = vmatmul.mubr.bf16.vlgmr.msra.gmra.mrb[8].mxu1 %v390_v11  ;;  %v60_v11 = vld [vmem:[%s1387_s1 + $0x180] sm:$0xff] }
 0x49d   :  { %867 = vmatpush3.bf16.msra.mxu1 %v1024_v19  ;;  %882 = vmatprep.mubr.msk.bf16.mxu1 %vm965_vm0, %v964_v3 }
 0x49e   :  { %868 = vmatprep.subr.bf16.mxu1 %v964_v3 }
 0x4a1   :  { %869 = vmatpush3.bf16.msra.mxu1 %v1033_v23 }
 0x4a2   :  { %870 = vmatprep.subr.bf16.mxu1 %v964_v3 }
 0x4a5   :  { %871 = vmatpush3.bf16.msra.mxu1 %v1049_v29 }
 0x4a6   :  { %872 = vmatprep.subr.bf16.mxu1 %v964_v3 }
 0x4a9   :  { %873 = vmatpush3.bf16.msra.mxu1 %v1065_v35 }
 0x4aa   :  { %874 = vmatprep.subr.bf16.mxu1 %v964_v3 }
 0x4ad   :  { %875 = vmatpush3.bf16.msra.mxu1 %v1097_v45 }
 0x4ae   :  { %876 = vmatprep.subr.bf16.mxu1 %v964_v3 }
 0x4b1   :  { %877 = vmatpush3.bf16.msra.mxu1 %v1109_v48 }
 0x4b2   :  { %878 = vmatprep.subr.bf16.mxu1 %v964_v3 }
 0x4b5   :  { %879 = vmatpush3.bf16.msra.mxu1 %v1120_v51 }
 0x4b6   :  { %880 = vmatprep.subr.bf16.mxu1 %v964_v3 }
 0x4b9   :  { %881 = vmatpush3.bf16.msra.mxu1 %v1132_v54 }
 0x4ba   :  { %906 = vmatprep.subr.bf16.mxu1 %v964_v3 }
 0x56f   :  { %v425_v12 = vpop.f32.mrb[8].mxu1 }
 0x570   :  { %v426_v13 = vadd.f32 %v1201_v25, %v425_v12  ;;  %v844_v14 = vpop.f32.mrb[9].mxu1 }
 0x571   :  { %v428_v15 = vpop.f32.mrb[10].mxu1 }
 0x572   :  { %v429_v16 = vadd.f32 %v1205_v27, %v428_v15  ;;  %v845_v17 = vpop.f32.mrb[11].mxu1  ;;  %948 = vtanh.f32 %v426_v13 }
 0x574   :  { %950 = vtanh.f32 %v429_v16 }
 0x57c   :  { %v949_v18 = vpop.eup %948 }
 0x57e   :  { %v951_v20 = vpop.eup %950 }
 0x57f   :  { %v434_v21 = vpack.c.bf16 %v951_v20, %v949_v18 }
 0x581   :  { %863 = vmatmul.mubr.bf16.vlgmr.msra.gmra.mrb[24].mxu0 %v434_v21 }
 0x582   :  { %887 = vmatpush3.bf16.msra.mxu0 %v1024_v19  ;;  %902 = vmatprep.mubr.msk.bf16.mxu0 %vm965_vm0, %v964_v3 }
 0x583   :  { %888 = vmatprep.subr.bf16.mxu0 %v964_v3 }
 0x586   :  { %889 = vmatpush3.bf16.msra.mxu0 %v1033_v23 }
 0x587   :  { %890 = vmatprep.subr.bf16.mxu0 %v964_v3 }
 0x58a   :  { %891 = vmatpush3.bf16.msra.mxu0 %v1049_v29 }
 0x58b   :  { %892 = vmatprep.subr.bf16.mxu0 %v964_v3 }
 0x58e   :  { %893 = vmatpush3.bf16.msra.mxu0 %v1065_v35 }
 0x58f   :  { %894 = vmatprep.subr.bf16.mxu0 %v964_v3 }
 0x592   :  { %895 = vmatpush3.bf16.msra.mxu0 %v1097_v45 }
 0x593   :  { %896 = vmatprep.subr.bf16.mxu0 %v964_v3 }
 0x596   :  { %897 = vmatpush3.bf16.msra.mxu0 %v1109_v48 }
 0x597   :  { %898 = vmatprep.subr.bf16.mxu0 %v964_v3 }
 0x59a   :  { %899 = vmatpush3.bf16.msra.mxu0 %v1120_v51  ;;  %v44_v51 = vld [vmem:[%s1387_s1 + $0x100] sm:$0xff] }
 0x59b   :  { %900 = vmatprep.subr.bf16.mxu0 %v964_v3 }
 0x59e   :  { %901 = vmatpush3.bf16.msra.mxu0 %v1132_v54  ;;  %v45_v54 = vld [vmem:[%s1387_s1 + $0x108] sm:$0xff] }
 0x59f   :  { %v78_v27 = vpack.c.bf16 %v45_v54, %v44_v51 }
 0x654   :  { %v469_v19 = vpop.f32.mrb[24].mxu0 }
 0x655   :  { %v470_v23 = vadd.f32 %v469_v19, %v1229_v41  ;;  %v864_v29 = vpop.f32.mrb[25].mxu0 }
 0x656   :  { %v472_v35 = vpop.f32.mrb[26].mxu0 }
 0x657   :  { %v473_v22 = vadd.f32 %v472_v35, %v1233_v43  ;;  %v865_v45 = vpop.f32.mrb[27].mxu0  ;;  %952 = vtanh.f32 %v470_v23 }
 0x659   :  { %954 = vtanh.f32 %v473_v22 }
 0x661   :  { %v953_v24 = vpop.eup %952 }
 0x663   :  { %v955_v48 = vpop.eup %954 }
 0x664   :  { %v478_v25 = vpack.c.bf16 %v955_v48, %v953_v24 }
 0x666   :  { %883 = vmatmul.mubr.bf16.vlgmr.msra.gmra.mrb[12].mxu1 %v478_v25 }
 0x667   :  { %922 = vmatprep.mubr.msk.bf16.mxu1 %vm965_vm0, %v964_v3  ;;  %907 = vmatpush3.bf16.msra.mxu1 %v78_v27 }
 0x668   :  { %908 = vmatprep.subr.bf16.mxu1 %v964_v3 }
 0x66b   :  { %909 = vmatpush3.bf16.msra.mxu1 %v79_v30 }
 0x66c   :  { %910 = vmatprep.subr.bf16.mxu1 %v964_v3 }
 0x66f   :  { %911 = vmatpush3.bf16.msra.mxu1 %v80_v33 }
 0x670   :  { %912 = vmatprep.subr.bf16.mxu1 %v964_v3 }
 0x673   :  { %913 = vmatpush3.bf16.msra.mxu1 %v81_v37 }
 0x674   :  { %914 = vmatprep.subr.bf16.mxu1 %v964_v3 }
 0x677   :  { %915 = vmatpush3.bf16.msra.mxu1 %v82_v55 }
 0x678   :  { %916 = vmatprep.subr.bf16.mxu1 %v964_v3 }
 0x67b   :  { %917 = vmatpush3.bf16.msra.mxu1 %v83_v58 }
 0x67c   :  { %918 = vmatprep.subr.bf16.mxu1 %v964_v3 }
 0x67f   :  { %919 = vmatpush3.bf16.msra.mxu1 %v84_v61 }
 0x680   :  { %920 = vmatprep.subr.bf16.mxu1 %v964_v3 }
 0x683   :  { %921 = vmatpush3.bf16.msra.mxu1 %v85_v0 }
 0x739   :  { %v513_v38 = vpop.f32.mrb[12].mxu1 }
 0x73a   :  { %v514_v39 = vadd.f32 %v1227_v40, %v513_v38  ;;  %v884_v41 = vpop.f32.mrb[13].mxu1 }
 0x73b   :  { %v516_v43 = vpop.f32.mrb[14].mxu1 }
 0x73c   :  { %v517_v44 = vadd.f32 %v1231_v42, %v516_v43  ;;  %v885_v46 = vpop.f32.mrb[15].mxu1  ;;  %956 = vtanh.f32 %v514_v39 }
 0x73e   :  { %958 = vtanh.f32 %v517_v44 }
 0x746   :  { %v957_v47 = vpop.eup %956 }
 0x748   :  { %v959_v49 = vpop.eup %958 }
 0x749   :  { %v522_v50 = vpack.c.bf16 %v959_v49, %v957_v47 }
 0x74b   :  { %903 = vmatmul.mubr.bf16.vlgmr.msra.gmra.mrb[28].mxu0 %v522_v50 }
 0x81e   :  { %v557_v1 = vpop.f32.mrb[28].mxu0 }
 0x81f   :  { %v558_v2 = vadd.f32 %v1227_v40, %v557_v1  ;;  %v904_v4 = vpop.f32.mrb[29].mxu0  ;;  %v61_v40 = vld [vmem:[%s1387_s1 + $0x188] sm:$0xff] }
 0x820   :  { %v560_v5 = vpop.f32.mrb[30].mxu0 }
 0x821   :  { %v561_v6 = vadd.f32 %v1231_v42, %v560_v5  ;;  %v905_v7 = vpop.f32.mrb[31].mxu0  ;;  %960 = vtanh.f32 %v558_v2 }
 0x823   :  { %962 = vtanh.f32 %v561_v6 }
 0x82b   :  { %v961_v8 = vpop.eup %960 }
 0x82d   :  { %v963_v9 = vpop.eup %962 }
 0x82e   :  { %v566_v10 = vpack.c.bf16 %v963_v9, %v961_v8 }
 0x830   :  { %923 = vmatmul.mubr.bf16.vlgmr.msra.gmra.mrb[16].mxu1 %v566_v10 }
 0x903   :  { %v601_v3 = vpop.f32.mrb[16].mxu1 }
 0x904   :  { %v602_v12 = vadd.f32 %v601_v3, %v60_v11  ;;  %v924_v13 = vpop.f32.mrb[17].mxu1 }
 0x905   :  { %v604_v14 = vpop.f32.mrb[18].mxu1 }
 0x906   :  { %608 = vst [vmem:[%s1389_s2] sm:$0xff] %v602_v12  ;;  %v605_v42 = vadd.f32 %v604_v14, %v61_v40  ;;  %v925_v15 = vpop.f32.mrb[19].mxu1 }
 0x908   :  { %609 = vst [vmem:[%s1389_s2 + $0x8] sm:$0xff] %v605_v42 }

</bundles_post_ra>
